<compile_context>
chip_gen: v6e
topology: v6e:2x2x1
jax: 0.10.0
libtpu: 0.0.40
codegen_flags: <defaults>
</compile_context>

<pallas_src>
import functools

import jax
import jax.numpy as jnp
import numpy as np
from jax.experimental import pallas as pl
from jax.experimental.pallas import tpu as pltpu


def _deconv_kernel(x_ref, w_ref, o_ref, acc_ref, *, S, J, T, Tpad, BB):
    """One grid step: BB (batch*source) slabs -> BB phase-major overlap-added slabs.

    x_ref  : [N, BB*Tpad]  basis coefficients, batch folded onto lanes; slab b lives in
                           columns [b*Tpad, b*Tpad + T) (columns beyond T are zero pad).
    w_ref  : [Kp, N]       ConvTranspose1d weight^T, tap axis zero-padded to Kp = J*S.
    o_ref  : [BB, S, Tq]   phase-major result, Tq = T + J - 1:
                           o[b, r, q] = full_b[q*S + r]  (uncropped deconv output).
    acc_ref: [S, Tq] f32   overlap-add scratch (reused across b).
    """
    # One MXU matmul for all BB slabs: [Kp, N] x [N, BB*Tpad] -> [Kp, BB*Tpad], f32 acc.
    C = jnp.dot(w_ref[...], x_ref[...], preferred_element_type=jnp.float32)

    for b in range(BB):
        base = b * Tpad
        # Polyphase overlap-add with static slices:
        #   acc[r, q] = sum_j C[j*S + r, base + (q - j)],  with (q - j) in [0, T).
        acc_ref[...] = jnp.zeros(acc_ref.shape, jnp.float32)
        for j in range(J):
            acc_ref[:, j:j + T] += C[j * S:(j + 1) * S, base:base + T]
        # Full-sublane (S rows), lane-dense (Tq columns) store.
        o_ref[b] = acc_ref[...].astype(o_ref.dtype)


def _pick_bb(BC, slab_bytes, target_bytes=2 << 20):
    """Largest divisor of BC whose input tile is <= ~target and leaves >= 2 grid steps."""
    cap = max(1, target_bytes // max(1, slab_bytes))
    best = 1
    for bb in range(1, BC + 1):
        if BC % bb != 0 or bb > cap:
            continue
        if BC // bb >= 2 or BC == 1:
            best = bb
    return best


def _vmem_limit_bytes():
    """~75% of physical VMEM: 96 MiB on v5e/v6e (128 MiB phys), 48 MiB on v7x (64 MiB)."""
    try:
        phys = int(pltpu.get_tpu_info().vmem_capacity_bytes)
    except Exception:
        phys = 64 << 20
    return max(32 << 20, min((phys * 3) // 4, 96 << 20))


def waveform_decoder_forward(masked_basis, weight, kernel_size, stride=None,
                             compute_dtype=jnp.bfloat16):
    """JAX/Pallas equivalent of WaveformDecoder.forward.

    masked_basis : [B, num_sources, N, T] or [B, N, T]
    weight       : [N, 1, K]  (torch ConvTranspose1d weight layout, bias=False)
    compute_dtype: MXU operand dtype (accumulation is always f32).
    """
    K = int(kernel_size)
    S = int(stride) if stride else K // 2
    P = (K - S + 1) // 2
    if P < 0:
        raise ValueError("stride > kernel_size + 1 gives negative ConvTranspose1d padding")

    orig_ndim = masked_basis.ndim
    x = masked_basis if orig_ndim >= 4 else masked_basis[:, None]      # [B, C, N, T]
    B, Csrc, N, T = x.shape
    out_dtype = masked_basis.dtype
    cdt = jnp.dtype(compute_dtype) if compute_dtype is not None else jnp.dtype(out_dtype)

    L_out = (T - 1) * S + K - 2 * P
    J = -(-K // S)                  # ceil(K / S)  -> number of tap groups
    Kp = J * S
    Tq = T + J - 1
    BC = B * Csrc

    # Lane-align each slab so any BB gives a 128-multiple lane block.
    Tpad = ((T + 127) // 128) * 128
    BB = _pick_bb(BC, N * Tpad * cdt.itemsize)

    # Single fused wrapper pass over the input: cast (+pad) + batch->lane transpose.
    xs = x.reshape(BC, N, T).astype(cdt)
    if Tpad > T:
        xs = jnp.pad(xs, ((0, 0), (0, 0), (0, Tpad - T)))
    x2 = jnp.transpose(xs, (1, 0, 2)).reshape(N, BC * Tpad)            # [N, BC*Tpad]

    w2 = weight[:, 0, :].astype(cdt)                                    # [N, K]
    if Kp > K:
        w2 = jnp.pad(w2, ((0, 0), (0, Kp - K)))                         # tiny, one-time
    wT = w2.T                                                           # [Kp, N]

    kernel = functools.partial(_deconv_kernel, S=S, J=J, T=T, Tpad=Tpad, BB=BB)

    o_pm = pl.pallas_call(
        kernel,
        out_shape=jax.ShapeDtypeStruct((BC, S, Tq), out_dtype),
        grid=(BC // BB,),
        in_specs=[
            pl.BlockSpec((N, BB * Tpad), lambda i: (0, i)),
            pl.BlockSpec((Kp, N), lambda i: (0, 0)),
        ],
        out_specs=pl.BlockSpec((BB, S, Tq), lambda i: (i, 0, 0)),
        scratch_shapes=[pltpu.VMEM((S, Tq), jnp.float32)],
        compiler_params=pltpu.CompilerParams(
            dimension_semantics=("parallel",),
            vmem_limit_bytes=_vmem_limit_bytes(),
        ),
    )(x2, wT)

    # Phase interleave + ConvTranspose1d padding crop: one fused XLA pass over the
    # (waveform-sized) output.  full_b[q*S + r] = o_pm[b, r, q]; wave = full[:, P:P+L_out].
    full = jnp.transpose(o_pm, (0, 2, 1)).reshape(BC, Tq * S)
    wave = jax.lax.slice(full, (0, P), (BC, P + L_out)).astype(out_dtype)

    if orig_ndim < 4:
        return wave.reshape(B, 1, L_out)       # torch: deconv1d(x) -> [B, 1, L_out]
    return wave.reshape(B, Csrc, L_out)        # torch: stack + squeeze(2) -> [B, C, L_out]


def _reference_conv_transpose(x4, weight, K, S, P):
    """Pure-JAX reference via lhs-dilated conv (== torch ConvTranspose1d), f32 HIGHEST."""
    B, Csrc, N, T = x4.shape
    rhs = jnp.flip(weight, axis=2).transpose(1, 0, 2)                   # [O=1, I=N, K]
    xf = x4.reshape(B * Csrc, N, T).astype(jnp.float32)
    y = jax.lax.conv_general_dilated(
        xf, rhs.astype(jnp.float32),
        window_strides=(1,), padding=[(K - 1 - P, K - 1 - P)],
        lhs_dilation=(S,), rhs_dilation=(1,),
        dimension_numbers=("NCH", "OIH", "NCH"),
        precision=jax.lax.Precision.HIGHEST,
    )
    return y.reshape(B, Csrc, y.shape[-1])


if __name__ == "__main__":
    # TasNet-style small config: num_filters=32; test both J=2 and J=4 tap groupings.
    num_filters = 32
    B, Csrc, T = 2, 2, 8           # batch, separated sources, encoded time frames

    key = jax.random.PRNGKey(0)
    k_w, k_x4, k_x3 = jax.random.split(key, 3)
    x4 = jax.random.normal(k_x4, (B, Csrc, num_filters, T), jnp.float32)
    x3 = jax.random.normal(k_x3, (B, num_filters, T), jnp.float32)

    # MXU matmuls run at bf16-pass precision; tolerance is set accordingly.
    TOL = dict(atol=3e-2, rtol=3e-2)

    for kernel_size, stride in ((16, 8), (16, 4)):
        padding = (kernel_size - stride + 1) // 2
        kw = jax.random.fold_in(k_w, kernel_size * 100 + stride)
        weight = 0.1 * jax.random.normal(kw, (num_filters, 1, kernel_size), jnp.float32)

        ref4 = _reference_conv_transpose(x4, weight, kernel_size, stride, padding)

        # 4-D path, default bf16 MXU operands.
        out4 = jax.block_until_ready(
            waveform_decoder_forward(x4, weight, kernel_size, stride))
        assert out4.shape == ref4.shape, (out4.shape, ref4.shape)
        assert np.allclose(np.asarray(out4), np.asarray(ref4), **TOL)

        # 4-D path, f32 operands (no-downcast path).
        out4_f32 = jax.block_until_ready(
            waveform_decoder_forward(x4, weight, kernel_size, stride,
                                     compute_dtype=jnp.float32))
        assert np.allclose(np.asarray(out4_f32), np.asarray(ref4), **TOL)

        # 3-D path (ndim < 4): [B, N, T] -> [B, 1, L_out].
        out3 = jax.block_until_ready(
            waveform_decoder_forward(x3, weight, kernel_size, stride))
        ref3 = _reference_conv_transpose(x3[:, None], weight, kernel_size, stride, padding)
        assert out3.shape == ref3.shape, (out3.shape, ref3.shape)
        assert np.allclose(np.asarray(out3), np.asarray(ref3), **TOL)

    print("KERNEL_OK")
</pallas_src>

<mosaic_0001>
module attributes {stable_mosaic.version = 11 : i64} {
  func.func @_deconv_kernel(%arg0: i32, %arg1: memref<32x256xbf16, #tpu.memory_space<vmem>>, %arg2: memref<16x32xbf16, #tpu.memory_space<vmem>>, %arg3: memref<2x8x9xf32, #tpu.memory_space<vmem>>, %arg4: memref<8x9xf32, #tpu.memory_space<vmem>>) attributes {dimension_semantics = [#tpu.dimension_semantics<parallel>], iteration_bounds = array<i64: 2>, scalar_prefetch = 0 : i64, scratch_operands = 1 : i64, tpu.core_type = #tpu.core_type<tc>, window_params = [{transform_indices = @transform_0, window_bounds = array<i64: 32, 256>}, {pipeline_mode = #tpu.pipeline_mode<synchronous>, transform_indices = @transform_1, window_bounds = array<i64: 16, 32>}, {transform_indices = @transform_2, window_bounds = array<i64: 2, 8, 9>}]} {
    %c0 = arith.constant 0 : index
    %c0_0 = arith.constant 0 : index
    %0 = vector.load %arg2[%c0, %c0_0] : memref<16x32xbf16, #tpu.memory_space<vmem>>, vector<16x32xbf16>
    %c0_1 = arith.constant 0 : index
    %c0_2 = arith.constant 0 : index
    %1 = vector.load %arg1[%c0_1, %c0_2] : memref<32x256xbf16, #tpu.memory_space<vmem>>, vector<32x256xbf16>
    %cst = arith.constant dense<0.000000e+00> : vector<16x256xf32>
    %2 = tpu.matmul %0, %1, %cst {dimension_numbers = #tpu.dot_dimension_numbers<[1], [0], [0], [1], [0, 0, 1, 1], [], []>} : vector<16x32xbf16>, vector<32x256xbf16>, vector<16x256xf32> -> vector<16x256xf32>
    %cst_3 = arith.constant 0.000000e+00 : f32
    %3 = vector.broadcast %cst_3 : f32 to vector<8x9xf32>
    %c0_4 = arith.constant 0 : index
    %c0_5 = arith.constant 0 : index
    %4 = vector.load %arg4[%c0_4, %c0_5] : memref<8x9xf32, #tpu.memory_space<vmem>>, vector<8x9xf32>
    tpu.vector_store %arg4[%c0_4, %c0_5], %3 {strides = array<i32>} : memref<8x9xf32, #tpu.memory_space<vmem>>, vector<8x9xf32>,
    %c0_6 = arith.constant 0 : index
    %c0_7 = arith.constant 0 : index
    %5 = vector.load %arg4[%c0_6, %c0_7] : memref<8x9xf32, #tpu.memory_space<vmem>>, vector<8x8xf32>
    %6 = vector.extract_strided_slice %2 {offsets = [0, 0], sizes = [8, 8], strides = [1, 1]} : vector<16x256xf32> to vector<8x8xf32>
    %7 = arith.addf %5, %6 : vector<8x8xf32>
    %c0_8 = arith.constant 0 : index
    %c0_9 = arith.constant 0 : index
    %8 = vector.load %arg4[%c0_8, %c0_9] : memref<8x9xf32, #tpu.memory_space<vmem>>, vector<8x8xf32>
    tpu.vector_store %arg4[%c0_8, %c0_9], %7 {strides = array<i32>} : memref<8x9xf32, #tpu.memory_space<vmem>>, vector<8x8xf32>,
    %c0_10 = arith.constant 0 : index
    %c1 = arith.constant 1 : index
    %9 = vector.load %arg4[%c0_10, %c1] : memref<8x9xf32, #tpu.memory_space<vmem>>, vector<8x8xf32>
    %10 = vector.extract_strided_slice %2 {offsets = [8, 0], sizes = [8, 8], strides = [1, 1]} : vector<16x256xf32> to vector<8x8xf32>
    %11 = arith.addf %9, %10 : vector<8x8xf32>
    %c0_11 = arith.constant 0 : index
    %c1_12 = arith.constant 1 : index
    %12 = vector.load %arg4[%c0_11, %c1_12] : memref<8x9xf32, #tpu.memory_space<vmem>>, vector<8x8xf32>
    tpu.vector_store %arg4[%c0_11, %c1_12], %11 {strides = array<i32>} : memref<8x9xf32, #tpu.memory_space<vmem>>, vector<8x8xf32>,
    %c0_13 = arith.constant 0 : index
    %c0_14 = arith.constant 0 : index
    %13 = vector.load %arg4[%c0_13, %c0_14] : memref<8x9xf32, #tpu.memory_space<vmem>>, vector<8x9xf32>
    %c0_15 = arith.constant 0 : index
    %c0_16 = arith.constant 0 : index
    %c0_17 = arith.constant 0 : index
    %14 = vector.load %arg3[%c0_15, %c0_16, %c0_17] : memref<2x8x9xf32, #tpu.memory_space<vmem>>, vector<1x8x9xf32>
    %15 = vector.shape_cast %14 : vector<1x8x9xf32> to vector<8x9xf32>
    %16 = vector.shape_cast %13 : vector<8x9xf32> to vector<1x8x9xf32>
    tpu.vector_store %arg3[%c0_15, %c0_16, %c0_17], %16 {strides = array<i32>} : memref<2x8x9xf32, #tpu.memory_space<vmem>>, vector<1x8x9xf32>,
    %cst_18 = arith.constant 0.000000e+00 : f32
    %17 = vector.broadcast %cst_18 : f32 to vector<8x9xf32>
    %c0_19 = arith.constant 0 : index
    %c0_20 = arith.constant 0 : index
    %18 = vector.load %arg4[%c0_19, %c0_20] : memref<8x9xf32, #tpu.memory_space<vmem>>, vector<8x9xf32>
    tpu.vector_store %arg4[%c0_19, %c0_20], %17 {strides = array<i32>} : memref<8x9xf32, #tpu.memory_space<vmem>>, vector<8x9xf32>,
    %c0_21 = arith.constant 0 : index
    %c0_22 = arith.constant 0 : index
    %19 = vector.load %arg4[%c0_21, %c0_22] : memref<8x9xf32, #tpu.memory_space<vmem>>, vector<8x8xf32>
    %20 = vector.extract_strided_slice %2 {offsets = [0, 128], sizes = [8, 8], strides = [1, 1]} : vector<16x256xf32> to vector<8x8xf32>
    %21 = arith.addf %19, %20 : vector<8x8xf32>
    %c0_23 = arith.constant 0 : index
    %c0_24 = arith.constant 0 : index
    %22 = vector.load %arg4[%c0_23, %c0_24] : memref<8x9xf32, #tpu.memory_space<vmem>>, vector<8x8xf32>
    tpu.vector_store %arg4[%c0_23, %c0_24], %21 {strides = array<i32>} : memref<8x9xf32, #tpu.memory_space<vmem>>, vector<8x8xf32>,
    %c0_25 = arith.constant 0 : index
    %c1_26 = arith.constant 1 : index
    %23 = vector.load %arg4[%c0_25, %c1_26] : memref<8x9xf32, #tpu.memory_space<vmem>>, vector<8x8xf32>
    %24 = vector.extract_strided_slice %2 {offsets = [8, 128], sizes = [8, 8], strides = [1, 1]} : vector<16x256xf32> to vector<8x8xf32>
    %25 = arith.addf %23, %24 : vector<8x8xf32>
    %c0_27 = arith.constant 0 : index
    %c1_28 = arith.constant 1 : index
    %26 = vector.load %arg4[%c0_27, %c1_28] : memref<8x9xf32, #tpu.memory_space<vmem>>, vector<8x8xf32>
    tpu.vector_store %arg4[%c0_27, %c1_28], %25 {strides = array<i32>} : memref<8x9xf32, #tpu.memory_space<vmem>>, vector<8x8xf32>,
    %c0_29 = arith.constant 0 : index
    %c0_30 = arith.constant 0 : index
    %27 = vector.load %arg4[%c0_29, %c0_30] : memref<8x9xf32, #tpu.memory_space<vmem>>, vector<8x9xf32>
    %c1_31 = arith.constant 1 : index
    %c0_32 = arith.constant 0 : index
    %c0_33 = arith.constant 0 : index
    %28 = vector.load %arg3[%c1_31, %c0_32, %c0_33] : memref<2x8x9xf32, #tpu.memory_space<vmem>>, vector<1x8x9xf32>
    %29 = vector.shape_cast %28 : vector<1x8x9xf32> to vector<8x9xf32>
    %30 = vector.shape_cast %27 : vector<8x9xf32> to vector<1x8x9xf32>
    tpu.vector_store %arg3[%c1_31, %c0_32, %c0_33], %30 {strides = array<i32>} : memref<2x8x9xf32, #tpu.memory_space<vmem>>, vector<1x8x9xf32>,
    return
  }
  func.func @transform_0(%arg0: i32) -> (i32, i32) {
    %c0_i32 = arith.constant 0 : i32
    %c0_i32_0 = arith.constant 0 : i32
    return %c0_i32, %arg0 : i32, i32
  }
  func.func @transform_1(%arg0: i32) -> (i32, i32) {
    %c0_i32 = arith.constant 0 : i32
    %c0_i32_0 = arith.constant 0 : i32
    %c0_i32_1 = arith.constant 0 : i32
    return %c0_i32, %c0_i32_0 : i32, i32
  }
  func.func @transform_2(%arg0: i32) -> (i32, i32, i32) {
    %c0_i32 = arith.constant 0 : i32
    %c0_i32_0 = arith.constant 0 : i32
    %c0_i32_1 = arith.constant 0 : i32
    return %arg0, %c0_i32, %c0_i32_0 : i32, i32, i32
  }
}

</mosaic_0001>

<bundles_post_ra>
// kernel: tpu_custom_call.1
= control target key start
LH: loop header
LB: loop body
LE: loop exit
PB: predicated region body
PF: predicated region fallthrough
CT: control target
= control target key end

     0   :  { %7 = vsyncpa [#allocation4], 0  ;;  %s826_s0 = inlined_call_operand.hbm [shape: bf16[32,512], index: 0, kind: input, shape index: {}]   ;;  %s827_s1 = inlined_call_operand.hbm [shape: bf16[16,32], index: 1, kind: input, shape index: {}]   ;;  %s828_s2 = inlined_call_operand.hbm [shape: f32[4,8,9], index: 2, kind: output, shape index: {}]  }
   0x1   :  { %9 = vsyncpa [#allocation4 + $0x1], 0 }
   0x2   :  { %10 = vsyncpa [#allocation7], 0 }
   0x3   :  { %11 = vsyncpa [#allocation5], 0 }
   0x4   :  { %13 = vsyncpa [#allocation5 + $0x1], 0  ;;  %s636_s9 = smov 0   ;;  %s638_s10 = smov 0  }
   0x5   :  { %s640_s11 = smov 0   ;;  %s642_s12 = smov 0  }
   0x6 LB: > { %s657_s13 = sadd.s32 4294967295, %s606_s12   ;;  %s385_s14 = sadd.s32 4294967294, %s606_s12   ;;  %s606_s12 = sphi %s642_s12, %s850_s12   ;;  %s602_s11 = sphi %s640_s11, %s849_s11   ;;  %s598_s10 = sphi %s638_s10, %s848_s10   ;;  %s594_s9 = sphi %s636_s9, %s847_s9  }
   0x7   : > { %s661_s15 = sadd.s32 1, %s606_s12   ;;  %s26_s16 = sadd.s32 1, %s602_s11 }
   0x8   : > { %s23_s17 = ssub.s32 %s606_s12, %s661_s15  ;;  %p33_p0 = scmp.ne.s32.totalorder %s602_s11, %s598_s10 }
   0x9   : > { %p24_p1 = scmp.eq.s32.totalorder %s23_s17, 0  ;;  %p34_p2 = scmp.eq.s32.totalorder %s606_s12, 0 }
   0xa   : > { %p39_p3 = scmp.ne.s32.totalorder %s598_s10, %s594_s9  ;;  %p832_p4 = scmp.eq.s32.totalorder %s657_s13, 0 }
   0xb   : > { %s673_s18 = scalar_select %p24_p1, %s602_s11, %s26_s16  }
   0xc   : > { %p675_p5 = por %p34_p2, %p33_p0  ;;  %p681_p6 = por %p832_p4, %p39_p3 }
   0xd   : > { %p84_p7 = scmp.eq.s32.totalorder %s657_s13, 1  ;;  %p90_p8 = scmp.eq.s32.totalorder %s385_s14, 1 }
   0xe   : > { %s834_s20 = scalar_select %p681_p6, 1, 0 }
   0xf   : > { %p386_p9 = scmp.ge.s32.totalorder %s606_s12, 1  ;;  %p97_p10 = scmp.lt.s32.totalorder %s606_s12, 3 }
  0x10   : > { %p688_p11 = por %p84_p7, %p33_p0  ;;  %p692_p12 = por %p90_p8, %p39_p3 }
  0x11   : > { %p696_p13 = pnand %p386_p9, %p97_p10  ;;  %s608_s24 = smov [#allocation6]  }
  0x12   : > { %s835_s21 = scalar_select %p688_p11, 1, 0 }
  0x13   : > { %s836_s22 = scalar_select %p692_p12, 1, 0 }
  0x14   : > { %s837_s23 = scalar_select %p696_p13, 1, 0 }
  0x15   : > { %p418_p1 = pneg %p696_p13  ;;  %s109_s25 = sshll.u32 %s608_s24, 4  ;;  %s110_s25 = int_to_ptr.vmem [resolvable:$true] %s109_s25 }
  0x16   : > { %p431_p3 = scmp.lt.s32.totalorder %s606_s12, 2  ;;  %s123_s27 = sand.u32 1, %s602_s11  }
  0x17   : > { %p704_p2 = pnand %p418_p1, %p832_p4  ;;  %s495_s28 = scalar_lea.vmem %s110_s25, 128 }
  0x18   : > { %p496_p8 = scmp.ne.s32.totalorder %s110_s25, %s495_s28  ;;  %p503_p12 = scmp.lt.s32.totalorder %s110_s25, %s110_s25 }
  0x19   : > { %p486_p7 = pneg %p704_p2  ;;  %p504_p11 = scmp.lt.s32.totalorder %s495_s28, %s495_s28 }
  0x1b   : > { %p498_p9 = pnand %p496_p8, %p486_p7  ;;  %p505_p6 = por %p504_p11, %p503_p12 }
  0x1d   : > { %p499_p10 = pneg %p498_p9 }
  0x1f   : > { %p506_p13 = pnand %p505_p6, %p499_p10 }
  0x21   : > { %509 = shalt.err (!%p506_p13)
}
  0x22   : > { %s609_s29 = smov 64   ;;  %s610_s30 = smov 4  }
  0x23   : > { %421 = dma.hbm_to_vmem [thread:$0]  (!%p704_p2), %s827_s1, 128, %s110_s25, [#allocation7], %s609_s29, %s609_s29, %s610_s30  }
  0x24   : > { %p722_p1 = pnand %p431_p3, %p675_p5  ;;  %s389_s6 = sshll.u32 %s123_s27, 5 }
  0x25   : > { %s408_s7 = sshll.u32 %s606_s12, 7  ;;  %s127_s17 = scalar_lea.vmem [#allocation3], %s389_s6 }
  0x26   : > { %s730_s16 = scalar_lea.hbm %s826_s0, %s408_s7  ;;  %s134_s24 = sshll.u32 %s127_s17, 4  ;;  %s732_s24 = int_to_ptr.vmem [resolvable:$true] %s134_s24 }
  0x27   : > { %s734_s19 = scalar_lea.sflag [#allocation4], %s123_s27  ;;  %s510_s25 = scalar_lea.hbm %s730_s16, 512 }
  0x28   : > { %p511_p5 = scmp.ne.s32.totalorder %s730_s16, %s510_s25  ;;  %p512_p6 = pneg %p722_p1 }
  0x29   : > { %s515_s29 = scalar_lea.hbm %s826_s0, 1024  ;;  %p516_p13 = scmp.lt.s32.totalorder %s730_s16, %s826_s0 }
  0x2a   : > { %p513_p11 = pnand %p512_p6, %p511_p5  ;;  %p517_p2 = scmp.lt.s32.totalorder %s515_s29, %s510_s25 }
  0x2c   : > { %p514_p12 = pneg %p513_p11  ;;  %p518_p3 = por %p517_p2, %p516_p13 }
  0x2e   : > { %p519_p7 = pnand %p518_p3, %p514_p12 }
  0x30   : > { %522 = shalt.err (!%p519_p7)
}
  0x31   : > { %s523_s27 = scalar_lea.vmem %s732_s24, 512  ;;  %s611_s4 = smov [#allocation3]  }
  0x32   : > { %p524_p8 = scmp.ne.s32.totalorder %s732_s24, %s523_s27  ;;  %s528_s6 = sshll.u32 %s611_s4, 4  ;;  %s529_s6 = int_to_ptr.vmem [resolvable:$false] %s528_s6 }
  0x33   : > { %s530_s7 = scalar_lea.vmem %s529_s6, 1024  ;;  %p531_p5 = scmp.lt.s32.totalorder %s732_s24, %s529_s6 }
  0x34   : > { %p526_p9 = pnand %p524_p8, %p512_p6  ;;  %p532_p11 = scmp.lt.s32.totalorder %s530_s7, %s523_s27 }
  0x36   : > { %p527_p10 = pneg %p526_p9  ;;  %p533_p0 = por %p532_p11, %p531_p5 }
  0x38   : > { %p534_p4 = pnand %p533_p0, %p527_p10 }
  0x3a   : > { %537 = shalt.err (!%p534_p4)
}
  0x3b   : > { %s612_s8 = smov 256   ;;  %s613_s14 = smov 128  }
  0x3c   : > { %s614_s17 = smov 8   ;;  %p840_p6 = scmp.ne.s32.totalorder %s837_s23, 0 }
  0x3d   : > { %425 = dma.hbm_to_vmem [thread:$0]  (!%p722_p1), %s730_s16, 512, %s732_s24, %s734_s19, %s612_s8, %s613_s14, %s614_s17  }
  0x3e   : > { %146 = sbr.rel (%p840_p6) target bundleno = 444 (0x1bc), region = 28  ;;  %s758_s25 = sand.u32 (!%p840_p6), 1, %s598_s10  }
  0x3f   : > { %s393_s26 = sshll.u32 (!%p840_p6), %s758_s25, 5  ;;  %s149_s28 = scalar_lea.sflag (!%p840_p6), [#allocation4], %s758_s25 }
  0x40   : > { %s152_s29 = scalar_lea.vmem (!%p840_p6), [#allocation3], %s393_s26  ;;  %p841_p4 = scmp.ne.s32.totalorder (!%p840_p6), %s834_s20, 0 }
  0x43   : > { %581 = dma.done.wait (%p841_p4), %s149_s28, 512  }
  0x44   : > { %583 = vsyncadd (%p841_p4), %s149_s28, 4294966784  ;;  %p842_p0 = scmp.eq.s32.totalorder %s657_s13, 0 }
  0x46   : > { %585 = dma.done.wait (%p842_p0), [#allocation7], 128   ;;  %p843_p1 = pmov %p842_p0 }
  0x47   : > { %v615_v0 = vmov 0   ;;  %v477_v1 = vld [vmem:[%s152_s29 + $0x14] ss:$8 sps:$4 sm:$0xff]   ;;  %v479_v2 = vld [vmem:[%s152_s29 + $0x10] ss:$8 sps:$4 sm:$0xff]   ;;  %v483_v5 = vld [vmem:[#allocation6] sm:$0xff]  }
  0x48   : > { %587 = vsyncadd (%p843_p1), [#allocation7], 4294967168  ;;  %247 = vmatprep.mubr.bf16.mxu0 %v615_v0  ;;  %227 = vmatprep.subr.bf16.mxu0 %v477_v1  ;;  %v480_v3 = vld [vmem:[%s152_s29 + $0x4] ss:$8 sps:$4 sm:$0xff]   ;;  %v482_v4 = vld [vmem:[%s152_s29] ss:$8 sps:$4 sm:$0xff]  }
  0x49   : > { %228 = vmatpush1.bf16.msra.mxu0 %v479_v2  ;;  %vm211_vm0 = vcmask 261120   ;;  %vm258_vm1 = vcmask 72704   ;;  %v616_v6 = vmov 0.0   ;;  %vm262_vm2 = vcmask 64512   ;;  %s617_s20 = smov 1   ;;  %s395_s23 = sshll.u32 %s758_s25, 4 }
  0x4a   : > { %229 = vmatprep.subr.bf16.mxu0 %v480_v3  ;;  %259 = vst.msk [vmem:[#allocation2] sm:$0xff] %vm258_vm1, %v616_v6  ;;  %vm270_vm3 = vcmask 72712   ;;  %s176_s5 = scalar_lea.vmem [#allocation8], %s395_s23  ;;  %s409_s16 = sshll.u32 %s657_s13, 8 }
  0x4b   : > { %s302_s24 = sshll.u32 %s176_s5, 4  ;;  %s780_s3 = scalar_lea.hbm %s828_s2, %s409_s16  ;;  %s782_s24 = int_to_ptr.vmem [resolvable:$true] %s302_s24 }
  0x4c   : > { %s289_s27 = scalar_lea.sflag [#allocation5], %s758_s25  ;;  %s538_s4 = scalar_lea.vmem %s782_s24, 256 }
  0x4d   : > { %230 = vmatpush1.bf16.msra.mxu0 %v482_v4  ;;  %p539_p12 = scmp.ne.s32.totalorder %s782_s24, %s538_s4  ;;  %p844_p13 = scmp.ne.s32.totalorder %s835_s21, 0 }
  0x4e   : > { %s618_s13 = smov [#allocation8]  }
  0x4f   : > { %p540_p2 = pnand %p539_p12, %p844_p13  ;;  %s542_s6 = sshll.u32 %s618_s13, 4  ;;  %s543_s6 = int_to_ptr.vmem [resolvable:$false] %s542_s6 }
  0x50   : > { %401 = vmatmul.mubr.msk.bf16.vlgmr.msra.gmra.mxu0 %vm211_vm0, %v483_v5  ;;  %s544_s7 = scalar_lea.vmem %s543_s6, 512  ;;  %p545_p7 = scmp.lt.s32.totalorder %s782_s24, %s543_s6 }
  0x51   : > { %v260_v7 = vld [vmem:[#allocation2] sm:$0xff]  ;;  %p541_p3 = pneg %p540_p2  ;;  %p546_p8 = scmp.lt.s32.totalorder %s544_s7, %s538_s4 }
  0x53   : > { %p547_p9 = por %p546_p8, %p545_p7 }
  0x55   : > { %p548_p10 = pnand %p547_p9, %p541_p3 }
 0x110   : > { %v249_v8 = vpop.f32.mrf.mxu0 }
 0x111   : > { %v261_v9 = vadd.f32 %v260_v7, %v249_v8 }
 0x112   : > { %v251_v10 = vpop.f32.mrf.mxu0 }
 0x113   : > { %263 = vst.msk [vmem:[#allocation2] sm:$0xff] %vm262_vm2, %v261_v9 }
 0x114   : > { %v253_v11 = vpop.f32.mrf.mxu0 }
 0x115   : > { %266 = vrot.lane.b32.xlu0 %v253_v11, %s617_s20 }
 0x116   : > { %v255_v12 = vpop.f32.mrf.mxu0 }
 0x119   : > { %280 = vrot.lane.b32.xlu0 %v255_v12, %s617_s20 }
 0x11a   : > { %v264_v13 = vld [vmem:[#allocation2] sm:$0xff] }
 0x187   : > { %v267_v14 = vpop.permute.xlu0 %266 }
 0x188   : > { %v269_v15 = vadd.f32 %v267_v14, %v264_v13 }
 0x18a   : > { %271 = vst.msk [vmem:[#allocation2] sm:$0xff] %vm270_vm3, %v269_v15 }
 0x18b   : > { %v281_v20 = vpop.permute.xlu0 %280 }
 0x191   : > { %v272_v16 = vld [vmem:[#allocation2] sm:$0xff] }
 0x192   : > { %274 = vst.msk [vmem:[#allocation2] sm:$0xff] %vm258_vm1, %v616_v6  ;;  %273 = vst.msk [vmem:[%s176_s5] sm:$0xff] %vm258_vm1, %v272_v16 }
 0x199   : > { %v275_v17 = vld [vmem:[#allocation2] sm:$0xff] }
 0x19a   : > { %v276_v18 = vadd.f32 %v275_v17, %v251_v10 }
 0x19c   : > { %277 = vst.msk [vmem:[#allocation2] sm:$0xff] %vm262_vm2, %v276_v18 }
 0x1a3   : > { %v278_v19 = vld [vmem:[#allocation2] sm:$0xff] }
 0x1a4   : > { %v283_v21 = vadd.f32 %v281_v20, %v278_v19 }
 0x1a6   : > { %284 = vst.msk [vmem:[#allocation2] sm:$0xff] %vm270_vm3, %v283_v21 }
 0x1ad   : > { %v285_v22 = vld [vmem:[#allocation2] sm:$0xff] }
 0x1ae   : > { %402 = vst.msk [vmem:[%s176_s5 + $0x8] sm:$0xff] %vm258_vm1, %v285_v22 }
 0x1af   : > { %551 = shalt.err (!%p548_p10)
}
 0x1b0   : > { %s552_s8 = scalar_lea.hbm %s780_s3, 256  ;;  %s556_s26 = scalar_lea.hbm %s828_s2, 512 }
 0x1b1   : > { %p553_p5 = scmp.ne.s32.totalorder %s780_s3, %s552_s8  ;;  %p557_p4 = scmp.lt.s32.totalorder %s780_s3, %s828_s2 }
 0x1b2   : > { %p558_p0 = scmp.lt.s32.totalorder %s556_s26, %s552_s8 }
 0x1b3   : > { %p554_p11 = pnand %p553_p5, %p844_p13 }
 0x1b4   : > { %p559_p1 = por %p558_p0, %p557_p4 }
 0x1b5   : > { %p555_p6 = pneg %p554_p11 }
 0x1b7   : > { %p560_p12 = pnand %p559_p1, %p555_p6 }
 0x1b9   : > { %563 = shalt.err (!%p560_p12)
}
 0x1ba   : > { %s619_s20 = smov 128   ;;  %s620_s23 = smov 8  }
 0x1bb   : > { %416 = dma.vmem_to_hbm [thread:$0]  (%p844_p13), %s782_s24, 256, %s780_s3, %s289_s27, %s619_s20, %s619_s20, %s620_s23  }
 0x1bc PF: > { %s317_s5 = sand.u32 1, %s594_s9   ;;  %p845_p2 = scmp.ne.s32.totalorder %s836_s22, 0 }
 0x1bd   : > { %p846_p3 = scmp.ge.s32.totalorder %s606_s12, 2  ;;  %s318_s16 = scalar_lea.sflag [#allocation5], %s317_s5 }
 0x1bf   : > { %p427_p7 = pnand %p846_p3, %p845_p2 }
 0x1c1   : > { %p428_p8 = pneg %p427_p7 }
 0x1c3   : > { %589 = dma.done.wait (%p428_p8), %s318_s16, 256  }
 0x1c4   : > { %591 = vsyncadd (%p428_p8), %s318_s16, 4294967040  ;;  %p16_p9 = scmp.ge.s32.totalorder %s661_s15, 4   ;;  %s847_s9 = smov %s598_s10 }
 0x1c5   : > { %s848_s10 = smov %s602_s11  ;;  %s849_s11 = smov %s673_s18 }
 0x1c6   : > { %s850_s12 = smov %s661_s15  ;;  %18 = sbr.rel (!%p16_p9) target bundleno = 6 (0x6), region = 78 }
 0x1cb   :  { %323 = vsyncpa [#allocation4], 1 }
 0x1cc   :  { %325 = vsyncpa [#allocation4 + $0x1], 1 }
 0x1cd   :  { %326 = vsyncpa [#allocation7], 1 }
 0x1ce   :  { %327 = vsyncpa [#allocation5], 1 }
 0x1cf   :  { %329 = vsyncpa [#allocation5 + $0x1], 1 }

</bundles_post_ra>
